<compile_context>
chip_gen: v7x
topology: tpu7x:2x2x1
jax: 0.10.0
libtpu: 0.0.40
codegen_flags: <defaults>
</compile_context>

<pallas_src>
import math
import functools

import jax
import jax.numpy as jnp
from jax import lax
from jax.experimental import pallas as pl
from jax.experimental.pallas import tpu as pltpu


# ----------------------------------------------------------------------------
# small helpers
# ----------------------------------------------------------------------------
def _round_up(x, m):
    return ((x + m - 1) // m) * m


def _pick_divisor(n, candidates):
    for c in candidates:
        if n % c == 0:
            return c
    return n


def _plan_tiles(S, block_q, block_k):
    """Pick (S_pad, ti, tj) so blocks always satisfy the (8, 128) tiling rules."""
    if S <= max(block_q, block_k, 128):
        s_pad = _round_up(S, 8)          # single tile; lane dim == full (padded) array dim
        return s_pad, s_pad, s_pad
    s_pad = _round_up(S, 128)
    ti = block_q if (block_q % 8 == 0 and s_pad % block_q == 0) else 128
    tj = block_k if (block_k % 128 == 0 and s_pad % block_k == 0) else 128
    return s_pad, ti, tj


# ----------------------------------------------------------------------------
# Projection kernels (fused QKV and final linear), row + output-column tiled
# ----------------------------------------------------------------------------
def _linear_kernel(x_ref, w_ref, b_ref, o_ref):
    o_ref[...] = (
        jnp.dot(x_ref[...], w_ref[...], preferred_element_type=jnp.float32)
        + b_ref[...]
    ).astype(o_ref.dtype)


def pallas_linear(x, w, b):
    """y = x @ w + b, x: [N, H_in]; row and output-column tiled."""
    N, H_in = x.shape
    H_out = w.shape[1]
    bn = _pick_divisor(N, (512, 256, 128, 64, 32, 16, 8))
    tn = H_out if H_out <= 512 else _pick_divisor(H_out, (512, 256, 128))
    # TODO(synk): also tile the contraction (H_in) dim for very large hidden sizes (v7x VMEM).
    return pl.pallas_call(
        _linear_kernel,
        out_shape=jax.ShapeDtypeStruct((N, H_out), x.dtype),
        grid=(N // bn, H_out // tn),
        in_specs=[
            pl.BlockSpec((bn, H_in), lambda i, j: (i, 0)),
            pl.BlockSpec((H_in, tn), lambda i, j: (0, j)),
            pl.BlockSpec((1, tn), lambda i, j: (0, j)),
        ],
        out_specs=pl.BlockSpec((bn, tn), lambda i, j: (i, j)),
        compiler_params=pltpu.CompilerParams(
            dimension_semantics=("parallel", "parallel"),
            vmem_limit_bytes=64 * 1024 * 1024,
        ),
    )(x, w, b.reshape(1, H_out))


def _qkv_kernel(xq_ref, xk_ref, xv_ref, wq_ref, wk_ref, wv_ref,
                bq_ref, bk_ref, bv_ref, q_ref, k_ref, v_ref):
    q_ref[...] = (jnp.dot(xq_ref[...], wq_ref[...], preferred_element_type=jnp.float32)
                  + bq_ref[...]).astype(q_ref.dtype)
    k_ref[...] = (jnp.dot(xk_ref[...], wk_ref[...], preferred_element_type=jnp.float32)
                  + bk_ref[...]).astype(k_ref.dtype)
    v_ref[...] = (jnp.dot(xv_ref[...], wv_ref[...], preferred_element_type=jnp.float32)
                  + bv_ref[...]).astype(v_ref.dtype)


def pallas_qkv_proj(query, key, value, wq, wk, wv, bq, bk, bv):
    """Fused Q/K/V projections: three inputs, three outputs, no host-side stack."""
    B, S, H = query.shape
    N = B * S
    bn = _pick_divisor(N, (512, 256, 128, 64, 32, 16, 8))
    tn = H if H <= 512 else _pick_divisor(H, (512, 256, 128))
    xq = query.reshape(N, H)
    xk = key.reshape(N, H)
    xv = value.reshape(N, H)
    out_sds = jax.ShapeDtypeStruct((N, H), query.dtype)
    x_spec = pl.BlockSpec((bn, H), lambda i, j: (i, 0))
    w_spec = pl.BlockSpec((H, tn), lambda i, j: (0, j))
    b_spec = pl.BlockSpec((1, tn), lambda i, j: (0, j))
    o_spec = pl.BlockSpec((bn, tn), lambda i, j: (i, j))
    q, k, v = pl.pallas_call(
        _qkv_kernel,
        out_shape=(out_sds, out_sds, out_sds),
        grid=(N // bn, H // tn),
        in_specs=[x_spec, x_spec, x_spec, w_spec, w_spec, w_spec,
                  b_spec, b_spec, b_spec],
        out_specs=(o_spec, o_spec, o_spec),
        compiler_params=pltpu.CompilerParams(
            dimension_semantics=("parallel", "parallel"),
            vmem_limit_bytes=64 * 1024 * 1024,
        ),
    )(xq, xk, xv, wq, wk, wv,
      bq.reshape(1, H), bk.reshape(1, H), bv.reshape(1, H))
    return q.reshape(B, S, H), k.reshape(B, S, H), v.reshape(B, S, H)


# ----------------------------------------------------------------------------
# RAT attention core: grid = (batch, i_tile, j_tile), all heads per step,
# flash-style online softmax over j tiles held in VMEM scratch.
# ----------------------------------------------------------------------------
def _rat_attn_kernel(q_ref, k_ref, v_ref, rel_ref, kp_ref, vp_ref, o_ref,
                     s_sc, rv_sc, m_sc, l_sc, acc_sc,
                     *, heads_num, per_head, scale, s_valid, masked):
    """One (batch, i_tile, j_tile) step.

    q_ref  : (ti, H)   all heads, lane-dense
    k_ref  : (tj, H)
    v_ref  : (tj, H)
    rel_ref: (D, ti, tj)   rel_ref[d, i, j] == rel[b, j, i, d]
    kp_ref : (1, H) flattened K-parameter ; vp_ref : (1, H) flattened V-parameter
    o_ref  : (ti, H)   written once, lane-dense, on the last j tile
    scratch: s_sc (Hn, ti, tj) scores / stashed p ; rv_sc (ti, H) rel-value staging ;
             m_sc (ti, Hn) running max ; l_sc (ti, H) running sum (head-replicated) ;
             acc_sc (ti, H) un-normalized output accumulator (all f32).
    """
    Hn, D = heads_num, per_head
    ti = q_ref.shape[0]
    tj = rel_ref.shape[2]
    jt = pl.program_id(2)

    @pl.when(jt == 0)
    def _init():
        m_sc[...] = jnp.full(m_sc.shape, -jnp.inf, m_sc.dtype)
        l_sc[...] = jnp.zeros(l_sc.shape, l_sc.dtype)
        acc_sc[...] = jnp.zeros(acc_sc.shape, acc_sc.dtype)

    # Hoisted per-step values: 1/sqrt(D) folded into q; K-parameter folded in lane-dense.
    q = q_ref[...].astype(jnp.float32) * scale                  # (ti, H)
    qk_all = q * kp_ref[...].astype(jnp.float32)                # (ti, H): q*kp*scale per column

    if masked:
        col_ids = jt * tj + lax.broadcasted_iota(jnp.int32, (ti, tj), 1)
        valid = col_ids < s_valid

    # ---- Phase A: scores for all heads into the (Hn, ti, tj) scratch -------------------
    # Base term per head on the MXU (no explicit k transpose).
    for h in range(Hn):
        lo = h * D
        s_sc[h] = lax.dot_general(
            q[:, lo:lo + D], k_ref[:, lo:lo + D],
            dimension_numbers=(((1,), (1,)), ((), ())),
            preferred_element_type=jnp.float32)
    # Relation term: d-loop OUTERMOST so each rel slab is loaded/cast once and reused by
    # every head (removes the Hn factor on rel VMEM loads).
    # TODO(synk): for very large Hn*D, switch these static loops to lax.fori_loop to keep
    # Mosaic compile time bounded; per-iteration temporaries already die here.
    for d in range(D):
        rel_d = rel_ref[d].astype(jnp.float32)                  # (ti, tj), once per d
        for h in range(Hn):
            c = qk_all[:, h * D + d:h * D + d + 1]              # (ti, 1) static lane slice
            s_sc[h] = s_sc[h] + c * rel_d

    # ---- Phase B: online softmax state + P @ V per head --------------------------------
    for h in range(Hn):
        lo = h * D
        s = s_sc[h]
        if masked:
            s = jnp.where(valid, s, -1e30)                      # mask padded key columns
        m_prev = m_sc[:, h:h + 1]
        m_new = jnp.maximum(m_prev, jnp.max(s, axis=-1, keepdims=True))
        alpha = jnp.exp(m_prev - m_new)
        p = jnp.exp(s - m_new)                                  # (ti, tj)
        m_sc[:, h:h + 1] = m_new
        # l kept lane-dense (replicated over the head's D columns) -> one full-width finalize.
        l_sc[:, lo:lo + D] = alpha * l_sc[:, lo:lo + D] + jnp.sum(p, axis=-1, keepdims=True)
        pv = jnp.dot(p.astype(v_ref.dtype), v_ref[:, lo:lo + D],
                     preferred_element_type=jnp.float32)        # (ti, D) on the MXU
        acc_sc[:, lo:lo + D] = alpha * acc_sc[:, lo:lo + D] + pv
        s_sc[h] = p                                             # stash p for Phase C

    # ---- Phase C: relation-value term; rel slab shared across heads, no concat ---------
    for d in range(D):
        rel_d = rel_ref[d].astype(jnp.float32)                  # (ti, tj), once per d
        for h in range(Hn):
            col = jnp.sum(s_sc[h] * rel_d, axis=-1, keepdims=True)   # (ti, 1)
            rv_sc[:, h * D + d:h * D + d + 1] = col             # store-only column write
    acc_sc[...] = acc_sc[...] + rv_sc[...] * vp_ref[...].astype(jnp.float32)

    @pl.when(jt == pl.num_programs(2) - 1)
    def _finalize():
        inv_l = pl.reciprocal(l_sc[...], approx=True)           # EUP reciprocal
        o_ref[...] = (acc_sc[...] * inv_l).astype(o_ref.dtype)  # single lane-dense store


def rat_attention_core(q, k, v, rel_r, kp_flat, vp_flat, *, heads_num, per_head,
                       s_valid, ti, tj):
    """q/k/v: [B, S_pad, H]; rel_r: [B, D, S_pad, S_pad] with rel_r[b,d,i,j]=rel[b,j,i,d]."""
    B, S_pad, H = q.shape
    D = per_head
    n_it = S_pad // ti
    n_jt = S_pad // tj
    kernel = functools.partial(
        _rat_attn_kernel,
        heads_num=heads_num, per_head=per_head,
        scale=1.0 / math.sqrt(float(per_head)),
        s_valid=s_valid, masked=(s_valid != S_pad))
    return pl.pallas_call(
        kernel,
        out_shape=jax.ShapeDtypeStruct((B, S_pad, H), q.dtype),
        grid=(B, n_it, n_jt),
        in_specs=[
            pl.BlockSpec((None, ti, H), lambda b, it, jt: (b, it, 0)),      # q row tile
            pl.BlockSpec((None, tj, H), lambda b, it, jt: (b, jt, 0)),      # k col tile
            pl.BlockSpec((None, tj, H), lambda b, it, jt: (b, jt, 0)),      # v col tile
            pl.BlockSpec((None, D, ti, tj), lambda b, it, jt: (b, 0, it, jt)),  # rel tile
            pl.BlockSpec((1, H), lambda b, it, jt: (0, 0)),                 # K param (flat)
            pl.BlockSpec((1, H), lambda b, it, jt: (0, 0)),                 # V param (flat)
        ],
        out_specs=pl.BlockSpec((None, ti, H), lambda b, it, jt: (b, it, 0)),
        scratch_shapes=[
            pltpu.VMEM((heads_num, ti, tj), jnp.float32),   # scores, reused to stash p
            pltpu.VMEM((ti, H), jnp.float32),               # rel-value staging (lane-dense)
            pltpu.VMEM((ti, heads_num), jnp.float32),       # running max m (per head)
            pltpu.VMEM((ti, H), jnp.float32),               # running sum l (head-replicated)
            pltpu.VMEM((ti, H), jnp.float32),               # output accumulator
        ],
        compiler_params=pltpu.CompilerParams(
            dimension_semantics=("parallel", "parallel", "arbitrary"),
            vmem_limit_bytes=64 * 1024 * 1024,
        ),
    )(q, k, v, rel_r, kp_flat, vp_flat)


# ----------------------------------------------------------------------------
# Module forward
# ----------------------------------------------------------------------------
def rat_mha_forward(key, value, query, relationship_matrix, params, dropout=None,
                    *, block_q=128, block_k=128):
    # `dropout` is accepted but unused, matching the PyTorch forward.
    # block_k can be swept to 256 on v6e (raise vmem_limit_bytes accordingly).
    B, S, H = key.shape
    Hn, D = params["kp"].shape

    S_pad, ti, tj = _plan_tiles(S, block_q, block_k)
    if S_pad != S:
        pad = S_pad - S
        query = jnp.pad(query, ((0, 0), (0, pad), (0, 0)))
        key = jnp.pad(key, ((0, 0), (0, pad), (0, 0)))
        value = jnp.pad(value, ((0, 0), (0, pad), (0, 0)))
        relationship_matrix = jnp.pad(relationship_matrix,
                                      ((0, 0), (0, pad), (0, pad), (0, 0)))

    # Fused Q/K/V projections (three inputs / three outputs, no host-side stack).
    q, k, v = pallas_qkv_proj(
        query, key, value,
        params["wq"], params["wk"], params["wv"],
        params["bq"], params["bk"], params["bv"])

    # One-time rel re-layout: rel_r[b, d, i, j] = rel[b, j, i, d] (bakes in transpose(1,3)
    # and puts a sequence axis on lanes).
    # TODO(synk): in production, produce relationship_matrix in this [B, D, S, S] layout
    # upstream once instead of re-transposing it every forward.
    rel_r = jnp.transpose(relationship_matrix, (0, 3, 2, 1))

    # TODO(synk): casting q/k/v/rel_r to bfloat16 here (f32 accumulation stays inside the
    # kernel) halves the dominant HBM/VMEM traffic and is a drop-in further lever.
    ctx = rat_attention_core(
        q, k, v, rel_r,
        params["kp"].reshape(1, H), params["vp"].reshape(1, H),
        heads_num=Hn, per_head=D, s_valid=S, ti=ti, tj=tj)       # [B, S_pad, H]

    out = pallas_linear(ctx.reshape(B * S_pad, H), params["wo"], params["bo"])
    out = out.reshape(B, S_pad, H)
    if S_pad != S:
        out = out[:, :S, :]
    return out


# ----------------------------------------------------------------------------
# Pure-JAX reference (mirrors the PyTorch code literally)
# ----------------------------------------------------------------------------
def rat_mha_reference(key, value, query, rel, params):
    B, S, H = key.shape
    Hn, D = params["kp"].shape

    def lin(x, w, b):
        return x @ w + b

    def shape(x):
        return x.reshape(B, S, Hn, D).transpose(0, 2, 1, 3)

    q = shape(lin(query, params["wq"], params["bq"]))
    k = shape(lin(key, params["wk"], params["bk"]))
    v = shape(lin(value, params["wv"], params["bv"]))

    relm = rel[:, :, :, None, :]                                   # [B,S,S,1,D]
    rel_K = relm * params["kp"][None, None, None]                  # [B,S,S,Hn,D]
    rel_V = relm * params["vp"][None, None, None]
    rel_K = jnp.transpose(rel_K, (0, 3, 2, 1, 4))                  # transpose(1,3)
    rel_V = jnp.transpose(rel_V, (0, 3, 2, 1, 4))

    scores = (q[:, :, :, None, :] * (k[:, :, None, :, :] + rel_K)).sum(-1)
    scores = scores / math.sqrt(float(D))
    probs = jax.nn.softmax(scores, axis=-1)

    out = (probs[..., None] * (v[:, :, None, :, :] + rel_V)).sum(-2)  # [B,Hn,S,D]
    out = out.transpose(0, 2, 1, 3).reshape(B, S, H)
    return lin(out, params["wo"], params["bo"])


# ----------------------------------------------------------------------------
if __name__ == "__main__":
    heads_num, per_head = 2, 16
    hidden = heads_num * per_head  # 32 ; relationship_number == per_head_size
    f32 = jnp.float32

    rng = jax.random.PRNGKey(0)
    pk = jax.random.split(rng, 11)
    bound = 1.0 / math.sqrt(float(hidden))
    params = {
        "wq": jax.random.uniform(pk[0], (hidden, hidden), f32, -bound, bound),
        "bq": jax.random.uniform(pk[1], (hidden,), f32, -bound, bound),
        "wk": jax.random.uniform(pk[2], (hidden, hidden), f32, -bound, bound),
        "bk": jax.random.uniform(pk[3], (hidden,), f32, -bound, bound),
        "wv": jax.random.uniform(pk[4], (hidden, hidden), f32, -bound, bound),
        "bv": jax.random.uniform(pk[5], (hidden,), f32, -bound, bound),
        "wo": jax.random.uniform(pk[6], (hidden, hidden), f32, -bound, bound),
        "bo": jax.random.uniform(pk[7], (hidden,), f32, -bound, bound),
        # torch.nn.init.uniform_ default range is [0, 1)
        "kp": jax.random.uniform(pk[8], (heads_num, per_head), f32, 0.0, 1.0),
        "vp": jax.random.uniform(pk[9], (heads_num, per_head), f32, 0.0, 1.0),
    }

    data_key = pk[10]
    # (B=2, S=8): tile-aligned path.  (B=2, S=10): exercises host padding + key masking.
    for (B, S) in ((2, 8), (2, 10)):
        data_key, k0, k1, k2, k3 = jax.random.split(data_key, 5)
        key_in = jax.random.normal(k0, (B, S, hidden), f32)
        value_in = jax.random.normal(k1, (B, S, hidden), f32)
        query_in = jax.random.normal(k2, (B, S, hidden), f32)
        rel_mat = jax.random.normal(k3, (B, S, S, per_head), f32)

        out = rat_mha_forward(key_in, value_in, query_in, rel_mat, params, dropout=0.1)
        out = jax.block_until_ready(out)
        ref = rat_mha_reference(key_in, value_in, query_in, rel_mat, params)

        assert out.shape == (B, S, hidden), out.shape
        # Tolerance 2e-3 accounts for the EUP approximate reciprocal in the softmax norm.
        max_err = float(jnp.max(jnp.abs(out - ref)))
        assert jnp.allclose(out, ref, rtol=2e-3, atol=2e-3), max_err

    print("KERNEL_OK")
</pallas_src>

<mosaic_0001>
module attributes {stable_mosaic.version = 11 : i64} {
  func.func @_qkv_kernel(%arg0: i32, %arg1: i32, %arg2: memref<16x32xf32, #tpu.memory_space<vmem>>, %arg3: memref<16x32xf32, #tpu.memory_space<vmem>>, %arg4: memref<16x32xf32, #tpu.memory_space<vmem>>, %arg5: memref<32x32xf32, #tpu.memory_space<vmem>>, %arg6: memref<32x32xf32, #tpu.memory_space<vmem>>, %arg7: memref<32x32xf32, #tpu.memory_space<vmem>>, %arg8: memref<1x32xf32, #tpu.memory_space<vmem>>, %arg9: memref<1x32xf32, #tpu.memory_space<vmem>>, %arg10: memref<1x32xf32, #tpu.memory_space<vmem>>, %arg11: memref<16x32xf32, #tpu.memory_space<vmem>>, %arg12: memref<16x32xf32, #tpu.memory_space<vmem>>, %arg13: memref<16x32xf32, #tpu.memory_space<vmem>>) attributes {dimension_semantics = [#tpu.dimension_semantics<parallel>, #tpu.dimension_semantics<parallel>], iteration_bounds = array<i64: 1, 1>, scalar_prefetch = 0 : i64, scratch_operands = 0 : i64, tpu.core_type = #tpu.core_type<tc>, window_params = [{transform_indices = @transform_0, window_bounds = array<i64: 16, 32>}, {transform_indices = @transform_1, window_bounds = array<i64: 16, 32>}, {transform_indices = @transform_2, window_bounds = array<i64: 16, 32>}, {transform_indices = @transform_3, window_bounds = array<i64: 32, 32>}, {transform_indices = @transform_4, window_bounds = array<i64: 32, 32>}, {transform_indices = @transform_5, window_bounds = array<i64: 32, 32>}, {transform_indices = @transform_6, window_bounds = array<i64: 1, 32>}, {transform_indices = @transform_7, window_bounds = array<i64: 1, 32>}, {transform_indices = @transform_8, window_bounds = array<i64: 1, 32>}, {transform_indices = @transform_9, window_bounds = array<i64: 16, 32>}, {transform_indices = @transform_10, window_bounds = array<i64: 16, 32>}, {transform_indices = @transform_11, window_bounds = array<i64: 16, 32>}]} {
    %c0 = arith.constant 0 : index
    %c0_0 = arith.constant 0 : index
    %0 = vector.load %arg2[%c0, %c0_0] : memref<16x32xf32, #tpu.memory_space<vmem>>, vector<16x32xf32>
    %c0_1 = arith.constant 0 : index
    %c0_2 = arith.constant 0 : index
    %1 = vector.load %arg5[%c0_1, %c0_2] : memref<32x32xf32, #tpu.memory_space<vmem>>, vector<32x32xf32>
    %cst = arith.constant dense<0.000000e+00> : vector<16x32xf32>
    %2 = tpu.matmul %0, %1, %cst {dimension_numbers = #tpu.dot_dimension_numbers<[1], [0], [0], [1], [0, 0, 1, 1], [], []>} : vector<16x32xf32>, vector<32x32xf32>, vector<16x32xf32> -> vector<16x32xf32>
    %c0_3 = arith.constant 0 : index
    %c0_4 = arith.constant 0 : index
    %3 = vector.load %arg8[%c0_3, %c0_4] : memref<1x32xf32, #tpu.memory_space<vmem>>, vector<1x32xf32>
    %4 = vector.broadcast %3 : vector<1x32xf32> to vector<16x32xf32>
    %5 = arith.addf %2, %4 : vector<16x32xf32>
    %c0_5 = arith.constant 0 : index
    %c0_6 = arith.constant 0 : index
    %6 = vector.load %arg11[%c0_5, %c0_6] : memref<16x32xf32, #tpu.memory_space<vmem>>, vector<16x32xf32>
    tpu.vector_store %arg11[%c0_5, %c0_6], %5 {strides = array<i32>} : memref<16x32xf32, #tpu.memory_space<vmem>>, vector<16x32xf32>,
    %c0_7 = arith.constant 0 : index
    %c0_8 = arith.constant 0 : index
    %7 = vector.load %arg3[%c0_7, %c0_8] : memref<16x32xf32, #tpu.memory_space<vmem>>, vector<16x32xf32>
    %c0_9 = arith.constant 0 : index
    %c0_10 = arith.constant 0 : index
    %8 = vector.load %arg6[%c0_9, %c0_10] : memref<32x32xf32, #tpu.memory_space<vmem>>, vector<32x32xf32>
    %cst_11 = arith.constant dense<0.000000e+00> : vector<16x32xf32>
    %9 = tpu.matmul %7, %8, %cst_11 {dimension_numbers = #tpu.dot_dimension_numbers<[1], [0], [0], [1], [0, 0, 1, 1], [], []>} : vector<16x32xf32>, vector<32x32xf32>, vector<16x32xf32> -> vector<16x32xf32>
    %c0_12 = arith.constant 0 : index
    %c0_13 = arith.constant 0 : index
    %10 = vector.load %arg9[%c0_12, %c0_13] : memref<1x32xf32, #tpu.memory_space<vmem>>, vector<1x32xf32>
    %11 = vector.broadcast %10 : vector<1x32xf32> to vector<16x32xf32>
    %12 = arith.addf %9, %11 : vector<16x32xf32>
    %c0_14 = arith.constant 0 : index
    %c0_15 = arith.constant 0 : index
    %13 = vector.load %arg12[%c0_14, %c0_15] : memref<16x32xf32, #tpu.memory_space<vmem>>, vector<16x32xf32>
    tpu.vector_store %arg12[%c0_14, %c0_15], %12 {strides = array<i32>} : memref<16x32xf32, #tpu.memory_space<vmem>>, vector<16x32xf32>,
    %c0_16 = arith.constant 0 : index
    %c0_17 = arith.constant 0 : index
    %14 = vector.load %arg4[%c0_16, %c0_17] : memref<16x32xf32, #tpu.memory_space<vmem>>, vector<16x32xf32>
    %c0_18 = arith.constant 0 : index
    %c0_19 = arith.constant 0 : index
    %15 = vector.load %arg7[%c0_18, %c0_19] : memref<32x32xf32, #tpu.memory_space<vmem>>, vector<32x32xf32>
    %cst_20 = arith.constant dense<0.000000e+00> : vector<16x32xf32>
    %16 = tpu.matmul %14, %15, %cst_20 {dimension_numbers = #tpu.dot_dimension_numbers<[1], [0], [0], [1], [0, 0, 1, 1], [], []>} : vector<16x32xf32>, vector<32x32xf32>, vector<16x32xf32> -> vector<16x32xf32>
    %c0_21 = arith.constant 0 : index
    %c0_22 = arith.constant 0 : index
    %17 = vector.load %arg10[%c0_21, %c0_22] : memref<1x32xf32, #tpu.memory_space<vmem>>, vector<1x32xf32>
    %18 = vector.broadcast %17 : vector<1x32xf32> to vector<16x32xf32>
    %19 = arith.addf %16, %18 : vector<16x32xf32>
    %c0_23 = arith.constant 0 : index
    %c0_24 = arith.constant 0 : index
    %20 = vector.load %arg13[%c0_23, %c0_24] : memref<16x32xf32, #tpu.memory_space<vmem>>, vector<16x32xf32>
    tpu.vector_store %arg13[%c0_23, %c0_24], %19 {strides = array<i32>} : memref<16x32xf32, #tpu.memory_space<vmem>>, vector<16x32xf32>,
    return
  }
  func.func @transform_0(%arg0: i32, %arg1: i32) -> (i32, i32) {
    %c0_i32 = arith.constant 0 : i32
    %c0_i32_0 = arith.constant 0 : i32
    return %arg0, %c0_i32 : i32, i32
  }
  func.func @transform_1(%arg0: i32, %arg1: i32) -> (i32, i32) {
    %c0_i32 = arith.constant 0 : i32
    %c0_i32_0 = arith.constant 0 : i32
    return %arg0, %c0_i32 : i32, i32
  }
  func.func @transform_2(%arg0: i32, %arg1: i32) -> (i32, i32) {
    %c0_i32 = arith.constant 0 : i32
    %c0_i32_0 = arith.constant 0 : i32
    return %arg0, %c0_i32 : i32, i32
  }
  func.func @transform_3(%arg0: i32, %arg1: i32) -> (i32, i32) {
    %c0_i32 = arith.constant 0 : i32
    %c0_i32_0 = arith.constant 0 : i32
    return %c0_i32, %arg1 : i32, i32
  }
  func.func @transform_4(%arg0: i32, %arg1: i32) -> (i32, i32) {
    %c0_i32 = arith.constant 0 : i32
    %c0_i32_0 = arith.constant 0 : i32
    return %c0_i32, %arg1 : i32, i32
  }
  func.func @transform_5(%arg0: i32, %arg1: i32) -> (i32, i32) {
    %c0_i32 = arith.constant 0 : i32
    %c0_i32_0 = arith.constant 0 : i32
    return %c0_i32, %arg1 : i32, i32
  }
  func.func @transform_6(%arg0: i32, %arg1: i32) -> (i32, i32) {
    %c0_i32 = arith.constant 0 : i32
    %c0_i32_0 = arith.constant 0 : i32
    return %c0_i32, %arg1 : i32, i32
  }
  func.func @transform_7(%arg0: i32, %arg1: i32) -> (i32, i32) {
    %c0_i32 = arith.constant 0 : i32
    %c0_i32_0 = arith.constant 0 : i32
    return %c0_i32, %arg1 : i32, i32
  }
  func.func @transform_8(%arg0: i32, %arg1: i32) -> (i32, i32) {
    %c0_i32 = arith.constant 0 : i32
    %c0_i32_0 = arith.constant 0 : i32
    return %c0_i32, %arg1 : i32, i32
  }
  func.func @transform_9(%arg0: i32, %arg1: i32) -> (i32, i32) {
    %c0_i32 = arith.constant 0 : i32
    return %arg0, %arg1 : i32, i32
  }
  func.func @transform_10(%arg0: i32, %arg1: i32) -> (i32, i32) {
    %c0_i32 = arith.constant 0 : i32
    return %arg0, %arg1 : i32, i32
  }
  func.func @transform_11(%arg0: i32, %arg1: i32) -> (i32, i32) {
    %c0_i32 = arith.constant 0 : i32
    return %arg0, %arg1 : i32, i32
  }
}

</mosaic_0001>

<bundles_post_ra>
// kernel: tpu_custom_call.1
= control target key start
LH: loop header
LB: loop body
LE: loop exit
PB: predicated region body
PF: predicated region fallthrough
CT: control target
= control target key end

     0   :  { %17 = vsyncpa [#allocation3], 0  ;;  %s1148_s0 = inlined_call_operand.hbm [shape: f32[16,32], index: 0, kind: input, shape index: {}]   ;;  %s1149_s1 = inlined_call_operand.hbm [shape: f32[16,32], index: 1, kind: input, shape index: {}]   ;;  %s1150_s2 = inlined_call_operand.hbm [shape: f32[16,32], index: 2, kind: input, shape index: {}]   ;;  %s1151_s3 = inlined_call_operand.hbm [shape: f32[32,32], index: 3, kind: input, shape index: {}]   ;;  %s1152_s4 = inlined_call_operand.hbm [shape: f32[32,32], index: 4, kind: input, shape index: {}]   ;;  %s1153_s5 = inlined_call_operand.hbm [shape: f32[32,32], index: 5, kind: input, shape index: {}]   ;;  %s1154_s6 = inlined_call_operand.hbm [shape: f32[1,32], index: 6, kind: input, shape index: {}]   ;;  %s1155_s7 = inlined_call_operand.hbm [shape: f32[1,32], index: 7, kind: input, shape index: {}]   ;;  %s1156_s8 = inlined_call_operand.hbm [shape: f32[1,32], index: 8, kind: input, shape index: {}]   ;;  %s1157_s9 = inlined_call_operand.hbm [shape: f32[16,32], index: 9, kind: output, shape index: {0}]   ;;  %s1158_s10 = inlined_call_operand.hbm [shape: f32[16,32], index: 10, kind: output, shape index: {1}]   ;;  %s1159_s11 = inlined_call_operand.hbm [shape: f32[16,32], index: 11, kind: output, shape index: {2}]  }
   0x1   :  { %18 = vsyncpa [#allocation6], 0 }
   0x2   :  { %19 = vsyncpa [#allocation9], 0 }
   0x3   :  { %20 = vsyncpa [#allocation12], 0 }
   0x4   :  { %21 = vsyncpa [#allocation15], 0 }
   0x5   :  { %22 = vsyncpa [#allocation4], 0 }
   0x6   :  { %23 = vsyncpa [#allocation19], 0  ;;  %s870_s17 = smov [#allocation5]   ;;  %s871_s19 = smov [#allocation8]  }
   0x7   :  { %s41_s18 = sshll.u32 %s870_s17, 4  ;;  %s65_s20 = sshll.u32 %s871_s19, 4  ;;  %s42_s18 = int_to_ptr.vmem [resolvable:$true] %s41_s18  ;;  %s944_s20 = int_to_ptr.vmem [resolvable:$true] %s65_s20 }
   0x8   :  { %s592_s23 = scalar_lea.hbm %s1149_s1, 256 }
   0x9   :  { %p593_p0 = scmp.ne.s32.totalorder %s1149_s1, %s592_s23  ;;  %p596_p1 = scmp.lt.u32.totalorder %s592_s23, %s1149_s1 }
   0xb   :  { %p598_p2 = pnand %p596_p1, %p593_p0 }
   0xd   :  { %601 = shalt.err (!%p598_p2)
}
   0xe   :  { %s602_s28 = scalar_lea.vmem %s42_s18, 256  ;;  %p607_p4 = scmp.lt.s32.totalorder %s42_s18, %s42_s18 }
   0xf   :  { %p603_p3 = scmp.ne.s32.totalorder %s42_s18, %s602_s28  ;;  %p608_p5 = scmp.lt.s32.totalorder %s602_s28, %s602_s28 }
  0x11   :  { %p609_p6 = por %p608_p5, %p607_p4 }
  0x13   :  { %p610_p7 = pnand %p609_p6, %p603_p3 }
  0x15   :  { %613 = shalt.err (!%p610_p7)
}
  0x16   :  { %s872_s29 = smov 128   ;;  %s873_s30 = smov 8  }
  0x17   :  { %47 = dma.hbm_to_vmem [thread:$0]  %s1149_s1, 256, %s42_s18, [#allocation6], %s872_s29, %s872_s29, %s873_s30  }
  0x18   :  { %s614_s16 = scalar_lea.hbm %s1151_s3, 512 }
  0x19   :  { %p615_p8 = scmp.ne.s32.totalorder %s1151_s3, %s614_s16  ;;  %p618_p9 = scmp.lt.u32.totalorder %s614_s16, %s1151_s3 }
  0x1b   :  { %p620_p10 = pnand %p618_p9, %p615_p8 }
  0x1d   :  { %623 = shalt.err (!%p620_p10)
}
  0x1e   :  { %s624_s23 = scalar_lea.vmem %s944_s20, 512  ;;  %p629_p12 = scmp.lt.s32.totalorder %s944_s20, %s944_s20 }
  0x1f   :  { %p625_p11 = scmp.ne.s32.totalorder %s944_s20, %s624_s23  ;;  %p630_p13 = scmp.lt.s32.totalorder %s624_s23, %s624_s23 }
  0x21   :  { %p631_p0 = por %p630_p13, %p629_p12 }
  0x23   :  { %p632_p1 = pnand %p631_p0, %p625_p11 }
  0x25   :  { %635 = shalt.err (!%p632_p1)
}
  0x26   :  { %71 = dma.hbm_to_vmem [thread:$0]  %s1151_s3, 512, %s944_s20, [#allocation9], %s872_s29, %s872_s29, %s873_s30  }
  0x27   :  { %s874_s24 = smov [#allocation11]   ;;  %s875_s26 = smov [#allocation14]  }
  0x28   :  { %s89_s25 = sshll.u32 %s874_s24, 4  ;;  %s112_s27 = sshll.u32 %s875_s26, 4  ;;  %s90_s25 = int_to_ptr.vmem [resolvable:$true] %s89_s25  ;;  %s113_s27 = int_to_ptr.vmem [resolvable:$true] %s112_s27 }
  0x29   :  { %s636_s13 = scalar_lea.hbm %s1153_s5, 512 }
  0x2a   :  { %p637_p2 = scmp.ne.s32.totalorder %s1153_s5, %s636_s13  ;;  %p640_p3 = scmp.lt.u32.totalorder %s636_s13, %s1153_s5 }
  0x2c   :  { %p642_p4 = pnand %p640_p3, %p637_p2 }
  0x2e   :  { %645 = shalt.err (!%p642_p4)
}
  0x2f   :  { %s646_s3 = scalar_lea.vmem %s90_s25, 512  ;;  %p651_p6 = scmp.lt.s32.totalorder %s90_s25, %s90_s25 }
  0x30   :  { %p647_p5 = scmp.ne.s32.totalorder %s90_s25, %s646_s3  ;;  %p652_p7 = scmp.lt.s32.totalorder %s646_s3, %s646_s3 }
  0x32   :  { %p653_p8 = por %p652_p7, %p651_p6 }
  0x34   :  { %p654_p9 = pnand %p653_p8, %p647_p5 }
  0x36   :  { %657 = shalt.err (!%p654_p9)
}
  0x37   :  { %95 = dma.hbm_to_vmem [thread:$0]  %s1153_s5, 512, %s90_s25, [#allocation12], %s872_s29, %s872_s29, %s873_s30  }
  0x38   :  { %s658_s23 = scalar_lea.hbm %s1155_s7, 16 }
  0x39   :  { %p659_p10 = scmp.ne.s32.totalorder %s1155_s7, %s658_s23  ;;  %p662_p11 = scmp.lt.u32.totalorder %s658_s23, %s1155_s7 }
  0x3b   :  { %p664_p12 = pnand %p662_p11, %p659_p10 }
  0x3d   :  { %667 = shalt.err (!%p664_p12)
}
  0x3e   :  { %s668_s28 = scalar_lea.vmem %s113_s27, 16  ;;  %s672_s12 = scalar_lea.vmem %s113_s27, 32 }
  0x3f   :  { %p669_p13 = scmp.ne.s32.totalorder %s113_s27, %s668_s28  ;;  %p673_p0 = scmp.lt.s32.totalorder %s113_s27, %s113_s27 }
  0x40   :  { %p674_p1 = scmp.lt.s32.totalorder %s672_s12, %s668_s28 }
  0x42   :  { %p675_p2 = por %p674_p1, %p673_p0 }
  0x44   :  { %p676_p3 = pnand %p675_p2, %p669_p13 }
  0x46   :  { %679 = shalt.err (!%p676_p3)
}
  0x47   :  { %115 = dma.hbm_to_vmem [thread:$0]  %s1155_s7, 16, %s113_s27, [#allocation15]  }
  0x48   :  { %s876_s13 = smov [#allocation2]   ;;  %s877_s15 = smov [#allocation7]  }
  0x49   :  { %s29_s14 = sshll.u32 %s876_s13, 4  ;;  %s53_s16 = sshll.u32 %s877_s15, 4  ;;  %s30_s14 = int_to_ptr.vmem [resolvable:$true] %s29_s14  ;;  %s1008_s16 = int_to_ptr.vmem [resolvable:$true] %s53_s16 }
  0x4a   :  { %s680_s20 = scalar_lea.hbm %s1148_s0, 256 }
  0x4b   :  { %p681_p4 = scmp.ne.s32.totalorder %s1148_s0, %s680_s20  ;;  %p684_p5 = scmp.lt.u32.totalorder %s680_s20, %s1148_s0 }
  0x4d   :  { %p686_p6 = pnand %p684_p5, %p681_p4 }
  0x4f   :  { %689 = shalt.err (!%p686_p6)
}
  0x50   :  { %s690_s7 = scalar_lea.vmem %s30_s14, 256  ;;  %p695_p8 = scmp.lt.s32.totalorder %s30_s14, %s30_s14 }
  0x51   :  { %p691_p7 = scmp.ne.s32.totalorder %s30_s14, %s690_s7  ;;  %p696_p9 = scmp.lt.s32.totalorder %s690_s7, %s690_s7 }
  0x53   :  { %p697_p10 = por %p696_p9, %p695_p8 }
  0x55   :  { %p698_p11 = pnand %p697_p10, %p691_p7 }
  0x57   :  { %701 = shalt.err (!%p698_p11)
}
  0x58   :  { %35 = dma.hbm_to_vmem [thread:$0]  %s1148_s0, 256, %s30_s14, [#allocation3], %s872_s29, %s872_s29, %s873_s30  }
  0x59   :  { %s702_s26 = scalar_lea.hbm %s1150_s2, 256 }
  0x5a   :  { %p703_p12 = scmp.ne.s32.totalorder %s1150_s2, %s702_s26  ;;  %p706_p13 = scmp.lt.u32.totalorder %s702_s26, %s1150_s2 }
  0x5c   :  { %p708_p0 = pnand %p706_p13, %p703_p12 }
  0x5e   :  { %711 = shalt.err (!%p708_p0)
}
  0x5f   :  { %s712_s13 = scalar_lea.vmem %s1008_s16, 256  ;;  %p717_p2 = scmp.lt.s32.totalorder %s1008_s16, %s1008_s16 }
  0x60   :  { %p713_p1 = scmp.ne.s32.totalorder %s1008_s16, %s712_s13  ;;  %p718_p3 = scmp.lt.s32.totalorder %s712_s13, %s712_s13 }
  0x62   :  { %p719_p4 = por %p718_p3, %p717_p2 }
  0x64   :  { %p720_p5 = pnand %p719_p4, %p713_p1 }
  0x66   :  { %723 = shalt.err (!%p720_p5)
}
  0x67   :  { %59 = dma.hbm_to_vmem [thread:$0]  %s1150_s2, 256, %s1008_s16, [#allocation6], %s872_s29, %s872_s29, %s873_s30  }
  0x68   :  { %s878_s15 = smov [#allocation10]   ;;  %s879_s3 = smov [#allocation13]  }
  0x69   :  { %s77_s17 = sshll.u32 %s878_s15, 4  ;;  %s102_s20 = sshll.u32 %s879_s3, 4  ;;  %s78_s17 = int_to_ptr.vmem [resolvable:$true] %s77_s17  ;;  %s103_s20 = int_to_ptr.vmem [resolvable:$true] %s102_s20 }
  0x6a   :  { %s724_s22 = scalar_lea.hbm %s1152_s4, 512 }
  0x6b   :  { %p725_p6 = scmp.ne.s32.totalorder %s1152_s4, %s724_s22  ;;  %p728_p7 = scmp.lt.u32.totalorder %s724_s22, %s1152_s4 }
  0x6d   :  { %p730_p8 = pnand %p728_p7, %p725_p6 }
  0x6f   :  { %733 = shalt.err (!%p730_p8)
}
  0x70   :  { %s734_s2 = scalar_lea.vmem %s78_s17, 512  ;;  %p739_p10 = scmp.lt.s32.totalorder %s78_s17, %s78_s17 }
  0x71   :  { %p735_p9 = scmp.ne.s32.totalorder %s78_s17, %s734_s2  ;;  %p740_p11 = scmp.lt.s32.totalorder %s734_s2, %s734_s2 }
  0x73   :  { %p741_p12 = por %p740_p11, %p739_p10 }
  0x75   :  { %p742_p13 = pnand %p741_p12, %p735_p9 }
  0x77   :  { %745 = shalt.err (!%p742_p13)
}
  0x78   :  { %83 = dma.hbm_to_vmem [thread:$0]  %s1152_s4, 512, %s78_s17, [#allocation9], %s872_s29, %s872_s29, %s873_s30  }
  0x79   :  { %s746_s28 = scalar_lea.hbm %s1154_s6, 16 }
  0x7a   :  { %p747_p0 = scmp.ne.s32.totalorder %s1154_s6, %s746_s28  ;;  %p750_p1 = scmp.lt.u32.totalorder %s746_s28, %s1154_s6 }
  0x7c   :  { %p752_p2 = pnand %p750_p1, %p747_p0 }
  0x7e   :  { %755 = shalt.err (!%p752_p2)
}
  0x7f   :  { %s756_s0 = scalar_lea.vmem %s103_s20, 16  ;;  %s760_s14 = scalar_lea.vmem %s103_s20, 32 }
  0x80   :  { %p757_p3 = scmp.ne.s32.totalorder %s103_s20, %s756_s0  ;;  %p761_p4 = scmp.lt.s32.totalorder %s103_s20, %s103_s20 }
  0x81   :  { %p762_p5 = scmp.lt.s32.totalorder %s760_s14, %s756_s0 }
  0x83   :  { %p763_p6 = por %p762_p5, %p761_p4 }
  0x85   :  { %p764_p7 = pnand %p763_p6, %p757_p3 }
  0x87   :  { %767 = shalt.err (!%p764_p7)
}
  0x88   :  { %105 = dma.hbm_to_vmem [thread:$0]  %s1154_s6, 16, %s103_s20, [#allocation12]  }
  0x89   :  { %s880_s17 = smov [#allocation16]   ;;  %s768_s22 = scalar_lea.hbm %s1156_s8, 16 }
  0x8a   :  { %s122_s3 = sshll.u32 %s880_s17, 4  ;;  %p769_p8 = scmp.ne.s32.totalorder %s1156_s8, %s768_s22  ;;  %s123_s3 = int_to_ptr.vmem [resolvable:$true] %s122_s3 }
  0x8b   :  { %p772_p9 = scmp.lt.u32.totalorder %s768_s22, %s1156_s8 }
  0x8d   :  { %p774_p10 = pnand %p772_p9, %p769_p8 }
  0x8f   :  { %777 = shalt.err (!%p774_p10)
}
  0x90   :  { %s778_s2 = scalar_lea.vmem %s123_s3, 16  ;;  %s782_s6 = scalar_lea.vmem %s123_s3, 32 }
  0x91   :  { %p779_p11 = scmp.ne.s32.totalorder %s123_s3, %s778_s2  ;;  %p783_p12 = scmp.lt.s32.totalorder %s123_s3, %s123_s3 }
  0x92   :  { %p784_p13 = scmp.lt.s32.totalorder %s782_s6, %s778_s2 }
  0x94   :  { %p785_p0 = por %p784_p13, %p783_p12 }
  0x96   :  { %p786_p1 = pnand %p785_p0, %p779_p11 }
  0x98   :  { %789 = shalt.err (!%p786_p1)
}
  0x99   :  { %125 = dma.hbm_to_vmem [thread:$0]  %s1156_s8, 16, %s123_s3, [#allocation15]  }
  0x9a   :  { %856 = dma.done.wait [#allocation3], 256  }
  0x9b   :  { %857 = vsyncadd [#allocation3], 4294967040 }
  0x9c   :  { %858 = dma.done.wait [#allocation6], 512  }
  0x9d   :  { %859 = vsyncadd [#allocation6], 4294966784 }
  0x9e   :  { %860 = dma.done.wait [#allocation9], 1024  }
  0x9f   :  { %861 = vsyncadd [#allocation9], 4294966272 }
  0xa0   :  { %862 = dma.done.wait [#allocation12], 528  }
  0xa1   :  { %863 = vsyncadd [#allocation12], 4294966768 }
  0xa2   :  { %864 = dma.done.wait [#allocation15], 32  }
  0xa3   :  { %865 = vsyncadd [#allocation15], 4294967264  ;;  %v155_v0 = vld [vmem:[#allocation8] sm:$0xff]  ;;  %v156_v1 = vld [vmem:[#allocation8 + $0x8] sm:$0xff]  ;;  %vm166_vm0 = vcmask 261120   ;;  %s881_s8 = smov [#allocation17]  }
  0xa4   :  { %v157_v2 = vld [vmem:[#allocation8 + $0x10] sm:$0xff]  ;;  %v554_v3 = vpack.c.bf16 %v156_v1, %v155_v0  ;;  %v158_v4 = vld [vmem:[#allocation8 + $0x18] sm:$0xff]  ;;  %v252_v5 = vld [vmem:[#allocation10] sm:$0xff]  ;;  %s447_s18 = sshll.u32 %s881_s8, 4  ;;  %s882_s24 = smov [#allocation18]   ;;  %s448_s18 = int_to_ptr.vmem [resolvable:$true] %s447_s18 }
  0xa5   :  { %v253_v6 = vld [vmem:[#allocation10 + $0x8] sm:$0xff]  ;;  %v558_v7 = vpack.c.bf16 %v158_v4, %v157_v2  ;;  %v153_v9 = vld [vmem:[#allocation2] sm:$0xff]  ;;  %v348_v10 = vld [vmem:[#allocation11] sm:$0xff]  ;;  %s459_s26 = sshll.u32 %s882_s24, 4  ;;  %s790_s28 = scalar_lea.vmem %s448_s18, 256  ;;  %s1091_s26 = int_to_ptr.vmem [resolvable:$true] %s459_s26 }
  0xa6   :  { %v562_v8 = vpack.c.bf16 %v253_v6, %v252_v5  ;;  %555 = vmatprep.subr.bf16.mxu0 %v554_v3  ;;  %529 = vmatprep.mubr.msk.f32.mxu0 %vm166_vm0, %v153_v9  ;;  %v349_v11 = vld [vmem:[#allocation11 + $0x8] sm:$0xff]  ;;  %v254_v12 = vld [vmem:[#allocation10 + $0x10] sm:$0xff]  ;;  %v255_v13 = vld [vmem:[#allocation10 + $0x18] sm:$0xff]  ;;  %p791_p2 = scmp.ne.s32.totalorder %s448_s18, %s790_s28  ;;  %p795_p3 = scmp.lt.s32.totalorder %s448_s18, %s448_s18 }
  0xa7   :  { %557 = vmatpush3.bf16.msra.mxu0 %v554_v3  ;;  %v566_v14 = vpack.c.bf16 %v255_v13, %v254_v12  ;;  %v250_v15 = vld [vmem:[#allocation5] sm:$0xff]  ;;  %v570_v16 = vpack.c.bf16 %v349_v11, %v348_v10  ;;  %v350_v17 = vld [vmem:[#allocation11 + $0x10] sm:$0xff]  ;;  %v351_v18 = vld [vmem:[#allocation11 + $0x18] sm:$0xff]  ;;  %p796_p4 = scmp.lt.s32.totalorder %s790_s28, %s790_s28 }
  0xa8   :  { %563 = vmatprep.subr.bf16.mxu1 %v562_v8  ;;  %559 = vmatprep.subr.bf16.mxu0 %v558_v7  ;;  %v154_v19 = vld [vmem:[#allocation2 + $0x8] sm:$0xff]  ;;  %v574_v20 = vpack.c.bf16 %v351_v18, %v350_v17  ;;  %v251_v21 = vld [vmem:[#allocation5 + $0x8] sm:$0xff]  ;;  %v346_v22 = vld [vmem:[#allocation7] sm:$0xff] }
  0xa9   :  { %565 = vmatpush3.bf16.msra.mxu1 %v562_v8  ;;  %540 = vmatprep.mubr.msk.f32.mxu1 %vm166_vm0, %v250_v15  ;;  %v347_v23 = vld [vmem:[#allocation7 + $0x8] sm:$0xff]  ;;  %v494_v24 = vld [vmem:[#allocation13] ss:$0 sm:$0xff]  ;;  %v497_v25 = vld [vmem:[#allocation14] ss:$0 sm:$0xff]  ;;  %p797_p5 = por %p796_p4, %p795_p3 }
  0xaa   :  { %567 = vmatprep.subr.bf16.mxu1 %v566_v14 }
  0xab   :  { %561 = vmatpush3.bf16.msra.mxu0 %v558_v7  ;;  %p798_p6 = pnand %p797_p5, %p791_p2 }
  0xac   :  { %571 = vmatprep.subr.bf16.mxu0 %v570_v16 }
  0xad   :  { %569 = vmatpush3.bf16.msra.mxu1 %v566_v14 }
  0xae   :  { %530 = vmatmul.mubr.msk.f32.vlgmr.msra.gmra.mrb[0].mxu0 %vm166_vm0, %v154_v19 }
  0xaf   :  { %573 = vmatpush3.bf16.msra.mxu0 %v570_v16  ;;  %551 = vmatprep.mubr.msk.f32.mxu0 %vm166_vm0, %v346_v22 }
  0xb0   :  { %541 = vmatmul.mubr.msk.f32.vlgmr.msra.gmra.mrb[0].mxu1 %vm166_vm0, %v251_v21  ;;  %575 = vmatprep.subr.bf16.mxu0 %v574_v20 }
  0xb3   :  { %577 = vmatpush3.bf16.msra.mxu0 %v574_v20 }
  0xb6   :  { %552 = vmatmul.mubr.msk.f32.vlgmr.msra.gmra.mrb[2].mxu0 %vm166_vm0, %v347_v23 }
 0x181   :  { %v531_v26 = vpop.f32.mrb[0].mxu0 }
 0x182   :  { %v245_v27 = vadd.f32 %v531_v26, %v494_v24  ;;  %v239_v28 = vpop.f32.mrb[1].mxu0 }
 0x183   :  { %v542_v29 = vpop.f32.mrb[0].mxu1  ;;  %v240_v30 = vadd.f32 %v494_v24, %v239_v28 }
 0x184   :  { %v341_v31 = vadd.f32 %v542_v29, %v497_v25  ;;  %v335_v32 = vpop.f32.mrb[1].mxu1  ;;  %249 = vst.msk [vmem:[#allocation17 + $0x8] sm:$0xff] %vm166_vm0, %v245_v27 }
 0x185   :  { %v336_v33 = vadd.f32 %v497_v25, %v335_v32  ;;  %248 = vst.msk [vmem:[#allocation17] sm:$0xff] %vm166_vm0, %v240_v30 }
 0x186   :  { %345 = vst.msk [vmem:[#allocation18 + $0x8] sm:$0xff] %vm166_vm0, %v341_v31 }
 0x187   :  { %344 = vst.msk [vmem:[#allocation18] sm:$0xff] %vm166_vm0, %v336_v33 }
 0x188   :  { %801 = shalt.err (!%p798_p6)
}
 0x189   :  { %s802_s25 = scalar_lea.hbm %s1157_s9, 256 }
 0x18a   :  { %p803_p7 = scmp.ne.s32.totalorder %s1157_s9, %s802_s25  ;;  %p806_p8 = scmp.lt.u32.totalorder %s802_s25, %s1157_s9 }
 0x18c   :  { %p808_p9 = pnand %p806_p8, %p803_p7 }
 0x18e   :  { %811 = shalt.err (!%p808_p9)
}
 0x18f   :  { %453 = dma.vmem_to_hbm [thread:$0]  %s448_s18, 256, %s1157_s9, [#allocation4], %s872_s29, %s872_s29, %s873_s30   ;;  %v500_v34 = vld [vmem:[#allocation16] ss:$0 sm:$0xff] }
 0x190   :  { %s812_s3 = scalar_lea.vmem %s1091_s26, 256  ;;  %p817_p11 = scmp.lt.s32.totalorder %s1091_s26, %s1091_s26 }
 0x191   :  { %p813_p10 = scmp.ne.s32.totalorder %s1091_s26, %s812_s3  ;;  %p818_p12 = scmp.lt.s32.totalorder %s812_s3, %s812_s3 }
 0x193   :  { %p819_p13 = por %p818_p12, %p817_p11 }
 0x195   :  { %p820_p0 = pnand %p819_p13, %p813_p10 }
 0x197   :  { %823 = shalt.err (!%p820_p0)
}
 0x198   :  { %s824_s22 = scalar_lea.hbm %s1158_s10, 256 }
 0x199   :  { %p825_p1 = scmp.ne.s32.totalorder %s1158_s10, %s824_s22  ;;  %p828_p2 = scmp.lt.u32.totalorder %s824_s22, %s1158_s10 }
 0x19b   :  { %p830_p3 = pnand %p828_p2, %p825_p1 }
 0x19d   :  { %833 = shalt.err (!%p830_p3)
}
 0x19e   :  { %465 = dma.vmem_to_hbm [thread:$0]  %s1091_s26, 256, %s1158_s10, [#allocation19], %s872_s29, %s872_s29, %s873_s30   ;;  %v553_v35 = vpop.f32.mrb[2].mxu0 }
 0x19f   :  { %s883_s6 = smov [#allocation20]   ;;  %v437_v36 = vadd.f32 %v553_v35, %v500_v34  ;;  %v431_v37 = vpop.f32.mrb[3].mxu0 }
 0x1a0   :  { %s471_s20 = sshll.u32 %s883_s6, 4  ;;  %v432_v38 = vadd.f32 %v500_v34, %v431_v37  ;;  %s472_s20 = int_to_ptr.vmem [resolvable:$true] %s471_s20 }
 0x1a1   :  { %441 = vst.msk [vmem:[#allocation20 + $0x8] sm:$0xff] %vm166_vm0, %v437_v36  ;;  %s834_s16 = scalar_lea.vmem %s472_s20, 256  ;;  %p839_p5 = scmp.lt.s32.totalorder %s472_s20, %s472_s20 }
 0x1a2   :  { %440 = vst.msk [vmem:[#allocation20] sm:$0xff] %vm166_vm0, %v432_v38  ;;  %p835_p4 = scmp.ne.s32.totalorder %s472_s20, %s834_s16  ;;  %p840_p6 = scmp.lt.s32.totalorder %s834_s16, %s834_s16 }
 0x1a4   :  { %p841_p7 = por %p840_p6, %p839_p5 }
 0x1a6   :  { %p842_p8 = pnand %p841_p7, %p835_p4 }
 0x1a8   :  { %845 = shalt.err (!%p842_p8)
}
 0x1a9   :  { %s846_s18 = scalar_lea.hbm %s1159_s11, 256 }
 0x1aa   :  { %p847_p9 = scmp.ne.s32.totalorder %s1159_s11, %s846_s18  ;;  %p850_p10 = scmp.lt.u32.totalorder %s846_s18, %s1159_s11 }
 0x1ac   :  { %p852_p11 = pnand %p850_p10, %p847_p9 }
 0x1ae   :  { %855 = shalt.err (!%p852_p11)
}
 0x1af   :  { %477 = dma.vmem_to_hbm [thread:$0]  %s472_s20, 256, %s1159_s11, [#allocation19], %s872_s29, %s872_s29, %s873_s30  }
 0x1b0   :  { %866 = dma.done.wait [#allocation4], 256  }
 0x1b1   :  { %867 = vsyncadd [#allocation4], 4294967040 }
 0x1b2   :  { %868 = dma.done.wait [#allocation19], 512  }
 0x1b3   :  { %869 = vsyncadd [#allocation19], 4294966784 }
 0x1b4   :  { %487 = vsyncpa [#allocation3], 1 }
 0x1b5   :  { %488 = vsyncpa [#allocation6], 1 }
 0x1b6   :  { %489 = vsyncpa [#allocation9], 1 }
 0x1b7   :  { %490 = vsyncpa [#allocation12], 1 }
 0x1b8   :  { %491 = vsyncpa [#allocation15], 1 }
 0x1b9   :  { %492 = vsyncpa [#allocation4], 1 }
 0x1ba   :  { %493 = vsyncpa [#allocation19], 1 }

</bundles_post_ra>
